<compile_context>
chip_gen: v7x
topology: tpu7x:2x2x1
jax: 0.10.0
libtpu: 0.0.40
codegen_flags: <defaults>
</compile_context>

<pallas_src>
import functools

import jax
import jax.numpy as jnp
from jax.experimental import pallas as pl
from jax.experimental.pallas import tpu as pltpu


# ----------------------------------------------------------------------------
# pltpu.roll direction probe (tiny one-off kernel, cached).  Guarantees the
# tap-shift sign is correct regardless of the rotate op's convention.
# ----------------------------------------------------------------------------
@functools.lru_cache(maxsize=None)
def _roll_matches_jnp_roll() -> bool:
    def _probe(x_ref, o_ref):
        o_ref[...] = pltpu.roll(x_ref[...], shift=1, axis=1)

    x = jnp.arange(8 * 128, dtype=jnp.float32).reshape(8, 128)
    got = pl.pallas_call(
        _probe, out_shape=jax.ShapeDtypeStruct((8, 128), jnp.float32))(x)
    if bool(jnp.array_equal(got, jnp.roll(x, 1, axis=1))):
        return True
    if bool(jnp.array_equal(got, jnp.roll(x, -1, axis=1))):
        return False
    raise AssertionError("unexpected pltpu.roll semantics")


# ----------------------------------------------------------------------------
# Fused ResidualGroup kernel (one grid step == one batch element)
# ----------------------------------------------------------------------------
def _residual_group_kernel(x_ref, wc_ref, bc_ref, wd_ref, bd_ref, wu_ref,
                           bu_ref, o_ref, *, H, W, C, n_blocks, compute_dtype,
                           roll_like_jnp):
    # x_ref : (C, HW)              wc_ref: (n_convs, C, 9C)   bc_ref: (n_convs, C, 1)
    # wd_ref: (n_blocks, C, Cr)    bd_ref: (n_blocks, 1, Cr)
    # wu_ref: (n_blocks, C, Cr)    bu_ref: (n_blocks, C, 1)
    # o_ref : (C, HW)
    HW = H * W

    # ---- per-tap shift amounts + border masks (hoisted; reused by all convs)
    pos = jax.lax.broadcasted_iota(jnp.int32, (C, HW), 1)
    row = pos // W
    colm = pos % W

    taps = []
    for dy in (-1, 0, 1):
        for dx in (-1, 0, 1):
            off = dy * W + dx                                 # flat offset
            shift = (-off) % HW if roll_like_jnp else off % HW
            conds = []
            if dy < 0:
                conds.append(row >= -dy)
            elif dy > 0:
                conds.append(row < H - dy)
            if dx < 0:
                conds.append(colm >= -dx)
            elif dx > 0:
                conds.append(colm < W - dx)
            mask = functools.reduce(jnp.logical_and, conds) if conds else None
            taps.append((shift, mask))

    def conv3x3(act_f32, idx):
        """3x3 'same' conv of act_f32 (C, HW) with conv #idx.  Returns f32."""
        pieces = []
        for shift, mask in taps:
            v = act_f32 if shift == 0 else pltpu.roll(act_f32, shift=shift,
                                                      axis=1)
            if mask is not None:
                v = jnp.where(mask, v, 0.0)
            pieces.append(v.astype(compute_dtype))
        patches = jnp.concatenate(pieces, axis=0)             # (9C, HW)
        out = jnp.dot(wc_ref[idx], patches,                   # (C, 9C)@(9C,HW)
                      preferred_element_type=jnp.float32)
        return out + bc_ref[idx]                              # (C, HW) f32

    x0 = x_ref[...].astype(jnp.float32)                       # (C, HW)
    res = x0
    for blk in range(n_blocks):                               # fully unrolled
        # conv -> ReLU -> conv
        y1 = jnp.maximum(conv3x3(res, 2 * blk), 0.0)
        y2 = conv3x3(y1, 2 * blk + 1)
        # Channel attention: GAP -> 1x1 -> ReLU -> 1x1 -> sigmoid -> scale
        pooled = jnp.mean(y2, axis=1, keepdims=True)          # (C, 1)
        z = jnp.sum(wd_ref[blk] * pooled, axis=0, keepdims=True) + bd_ref[blk]
        z = jnp.maximum(z, 0.0)                               # (1, Cr)
        s = jnp.sum(wu_ref[blk] * z, axis=1, keepdims=True) + bu_ref[blk]
        s = jax.nn.sigmoid(s)                                 # (C, 1)
        # RCAB residual
        res = res + y2 * s

    # Final conv of the group + group-level residual with the original input.
    out = conv3x3(res, 2 * n_blocks) + x0
    o_ref[...] = out.astype(o_ref.dtype)


# ----------------------------------------------------------------------------
# Wrapper
# ----------------------------------------------------------------------------
def residual_group_forward(x, params, *, compute_dtype=jnp.bfloat16):
    """x: (N, C, H, W) NCHW, same as the PyTorch module."""
    N, C, H, W = x.shape
    HW = H * W

    conv_w, conv_b = params["conv_w"], params["conv_b"]   # (nc,C,C,3,3), (nc,C)
    n_convs = conv_w.shape[0]
    n_blocks = (n_convs - 1) // 2
    Cr = params["ca_w_down"].shape[1]

    # Pack weights: tap-major im2col layout (C_out, (ky,kx,ci)) per conv.
    wc = jnp.transpose(conv_w, (0, 1, 3, 4, 2)).reshape(
        n_convs, C, 9 * C).astype(compute_dtype)
    bc = conv_b.reshape(n_convs, C, 1).astype(jnp.float32)
    wd = jnp.transpose(params["ca_w_down"], (0, 2, 1)).astype(jnp.float32)
    bd = params["ca_b_down"].reshape(n_blocks, 1, Cr).astype(jnp.float32)
    wu = params["ca_w_up"].astype(jnp.float32)               # (nb, C, Cr)
    bu = params["ca_b_up"].reshape(n_blocks, C, 1).astype(jnp.float32)

    x_flat = x.reshape(N, C, HW)                              # free for NCHW

    kern = functools.partial(
        _residual_group_kernel, H=H, W=W, C=C, n_blocks=n_blocks,
        compute_dtype=compute_dtype, roll_like_jnp=_roll_matches_jnp_roll())

    def _nbytes(a):
        return a.size * a.dtype.itemsize

    # Explicit VMEM budget (review item): resident weights (x2 slack),
    # double-buffered in/out blocks, im2col patches + live f32 temps.
    cdt = jnp.dtype(compute_dtype).itemsize
    weight_bytes = sum(_nbytes(a) for a in (wc, bc, wd, bd, wu, bu))
    est = (2 * weight_bytes
           + 2 * 2 * C * HW * 4                 # in + out blocks, double-buffered
           + 9 * C * HW * cdt                   # patches
           + 8 * C * HW * 4)                    # live f32 activations / temps
    vmem_limit = int(min(32 * 2 ** 20, max(8 * 2 ** 20, 4 * est)))

    conv_flops = 2 * N * n_convs * 9 * C * C * HW
    ca_flops = 4 * N * n_blocks * C * Cr
    bytes_accessed = 2 * N * C * HW * x.dtype.itemsize + weight_bytes

    grid_spec = pltpu.PrefetchScalarGridSpec(
        num_scalar_prefetch=0,
        grid=(N,),
        in_specs=[
            pl.BlockSpec((None, C, HW), lambda n: (n, 0, 0)),
            pl.BlockSpec(wc.shape, lambda n: (0, 0, 0)),   # resident weights
            pl.BlockSpec(bc.shape, lambda n: (0, 0, 0)),
            pl.BlockSpec(wd.shape, lambda n: (0, 0, 0)),
            pl.BlockSpec(bd.shape, lambda n: (0, 0, 0)),
            pl.BlockSpec(wu.shape, lambda n: (0, 0, 0)),
            pl.BlockSpec(bu.shape, lambda n: (0, 0, 0)),
        ],
        out_specs=pl.BlockSpec((None, C, HW), lambda n: (n, 0, 0)),
    )

    out_flat = pl.pallas_call(
        kern,
        out_shape=jax.ShapeDtypeStruct((N, C, HW), x.dtype),
        grid_spec=grid_spec,
        compiler_params=pltpu.CompilerParams(
            dimension_semantics=("parallel",),
            vmem_limit_bytes=vmem_limit),
        cost_estimate=pl.CostEstimate(
            flops=conv_flops + ca_flops,
            transcendentals=N * n_blocks * C,
            bytes_accessed=bytes_accessed),
    )(x_flat, wc, bc, wd, bd, wu, bu)

    return out_flat.reshape(N, C, H, W)


# ----------------------------------------------------------------------------
# Parameter construction (torch-like layouts) + pure-JAX reference
# ----------------------------------------------------------------------------
def init_params(key, n_feat, reduction, n_resblocks):
    c, cr = n_feat, n_feat // reduction
    n_convs = 2 * n_resblocks + 1
    scale = 0.05
    k = jax.random.split(key, 6)
    return dict(
        conv_w=scale * jax.random.normal(k[0], (n_convs, c, c, 3, 3), jnp.float32),
        conv_b=scale * jax.random.normal(k[1], (n_convs, c), jnp.float32),
        ca_w_down=scale * jax.random.normal(k[2], (n_resblocks, cr, c), jnp.float32),
        ca_b_down=scale * jax.random.normal(k[3], (n_resblocks, cr), jnp.float32),
        ca_w_up=scale * jax.random.normal(k[4], (n_resblocks, c, cr), jnp.float32),
        ca_b_up=scale * jax.random.normal(k[5], (n_resblocks, c), jnp.float32),
    )


def _reference_forward(x, params):
    """Pure-JAX NCHW reference (f32, Precision.HIGHEST convs)."""
    wc, bc = params["conv_w"], params["conv_b"]
    wd, bd = params["ca_w_down"], params["ca_b_down"]
    wu, bu = params["ca_w_up"], params["ca_b_up"]
    n_convs = wc.shape[0]
    n_blocks = (n_convs - 1) // 2

    def conv3x3(a, i):
        y = jax.lax.conv_general_dilated(
            a, wc[i], window_strides=(1, 1), padding=((1, 1), (1, 1)),
            dimension_numbers=("NCHW", "OIHW", "NCHW"),
            precision=jax.lax.Precision.HIGHEST)
        return y + bc[i][None, :, None, None]

    res = x
    for i in range(n_blocks):
        y1 = jnp.maximum(conv3x3(res, 2 * i), 0.0)
        y2 = conv3x3(y1, 2 * i + 1)
        pooled = jnp.mean(y2, axis=(2, 3))                    # (N, C)
        z = jnp.maximum(pooled @ wd[i].T + bd[i], 0.0)        # (N, Cr)
        s = jax.nn.sigmoid(z @ wu[i].T + bu[i])               # (N, C)
        res = res + y2 * s[:, :, None, None]
    return conv3x3(res, 2 * n_blocks) + x


if __name__ == "__main__":
    key = jax.random.PRNGKey(0)
    N, C, H, W = 2, 32, 16, 16          # NCHW, same as the PyTorch module
    n_resblocks, reduction = 2, 8

    kx, kp = jax.random.split(key)
    x = jax.random.normal(kx, (N, C, H, W), jnp.float32)
    params = init_params(kp, C, reduction, n_resblocks)

    ref = jax.block_until_ready(_reference_forward(x, params))

    # f32-operand path (default MXU precision); error budget matches the
    # previously validated kernel at these shapes.
    out_f32 = jax.block_until_ready(
        residual_group_forward(x, params, compute_dtype=jnp.float32))
    assert out_f32.shape == x.shape
    assert bool(jnp.all(jnp.isfinite(out_f32)))
    err_f32 = float(jnp.max(jnp.abs(out_f32 - ref)))
    assert err_f32 < 5e-2, f"f32 path max abs error vs reference: {err_f32}"

    # bf16-operand path (default / fast).  Budget: ~0.2% relative rounding per
    # K=288 conv over 2*n_resblocks+1 chained convs on O(1) activations.
    out_bf16 = jax.block_until_ready(residual_group_forward(x, params))
    assert out_bf16.shape == x.shape
    assert bool(jnp.all(jnp.isfinite(out_bf16)))
    err_bf16 = float(jnp.max(jnp.abs(out_bf16.astype(jnp.float32) - ref)))
    assert err_bf16 < 1e-1, f"bf16 path max abs error vs reference: {err_bf16}"

    print("KERNEL_OK")
</pallas_src>

<mosaic_0001>
module attributes {stable_mosaic.version = 11 : i64} {
  func.func @_probe(%arg0: memref<8x128xf32, #tpu.memory_space<vmem>>, %arg1: memref<8x128xf32, #tpu.memory_space<vmem>>) attributes {dimension_semantics = [], scalar_prefetch = 0 : i64, scratch_operands = 0 : i64, tpu.core_type = #tpu.core_type<tc>} {
    %c0 = arith.constant 0 : index
    %c0_0 = arith.constant 0 : index
    %0 = vector.load %arg0[%c0, %c0_0] : memref<8x128xf32, #tpu.memory_space<vmem>>, vector<8x128xf32>
    %c1_i32 = arith.constant 1 : i32
    %1 = tpu.dynamic_rotate %0 by %c1_i32 dim 1 : vector<8x128xf32>, i32 -> vector<8x128xf32>
    %c0_1 = arith.constant 0 : index
    %c0_2 = arith.constant 0 : index
    %2 = vector.load %arg1[%c0_1, %c0_2] : memref<8x128xf32, #tpu.memory_space<vmem>>, vector<8x128xf32>
    tpu.vector_store %arg1[%c0_1, %c0_2], %1 {strides = array<i32>} : memref<8x128xf32, #tpu.memory_space<vmem>>, vector<8x128xf32>,
    return
  }
}

</mosaic_0001>

<bundles_post_ra>
// kernel: tpu_custom_call.1
= control target key start
LH: loop header
LB: loop body
LE: loop exit
PB: predicated region body
PF: predicated region fallthrough
CT: control target
= control target key end

     0   :  { %6 = vsyncpa [#allocation3], 0  ;;  %s128_s0 = inlined_call_operand.hbm [shape: f32[8,128], index: 0, kind: input, shape index: {}]   ;;  %s129_s1 = inlined_call_operand.hbm [shape: f32[8,128], index: 1, kind: output, shape index: {}]  }
   0x1   :  { %7 = vsyncpa [#allocation4], 0  ;;  %s91_s6 = smov [#allocation2]   ;;  %s43_s10 = scalar_lea.hbm %s128_s0, 128 }
   0x2   :  { %s14_s7 = sshll.u32 %s91_s6, 4  ;;  %p44_p0 = scmp.ne.s32.totalorder %s128_s0, %s43_s10  ;;  %s15_s7 = int_to_ptr.vmem [resolvable:$true] %s14_s7 }
   0x3   :  { %p47_p1 = scmp.lt.u32.totalorder %s43_s10, %s128_s0 }
   0x5   :  { %p49_p2 = pnand %p47_p1, %p44_p0 }
   0x7   :  { %52 = shalt.err (!%p49_p2)
}
   0x8   :  { %s53_s15 = scalar_lea.vmem %s15_s7, 128  ;;  %p58_p4 = scmp.lt.s32.totalorder %s15_s7, %s15_s7 }
   0x9   :  { %p54_p3 = scmp.ne.s32.totalorder %s15_s7, %s53_s15  ;;  %p59_p5 = scmp.lt.s32.totalorder %s53_s15, %s53_s15 }
   0xb   :  { %p60_p6 = por %p59_p5, %p58_p4 }
   0xd   :  { %p61_p7 = pnand %p60_p6, %p54_p3 }
   0xf   :  { %64 = shalt.err (!%p61_p7)
}
  0x10   :  { %17 = dma.hbm_to_vmem [thread:$0]  %s128_s0, 128, %s15_s7, [#allocation3]  }
  0x11   :  { %87 = dma.done.wait [#allocation3], 128  }
  0x12   :  { %88 = vsyncadd [#allocation3], 4294967168  ;;  %v21_v0 = vld [vmem:[#allocation2] sm:$0xff]  ;;  %s92_s18 = smov 1   ;;  %s93_s19 = smov [#allocation5]  }
  0x13   :  { %22 = vrot.lane.b32.xlu0 %v21_v0, %s92_s18  ;;  %s31_s20 = sshll.u32 %s93_s19, 4  ;;  %s32_s20 = int_to_ptr.vmem [resolvable:$true] %s31_s20 }
  0x14   :  { %s65_s21 = scalar_lea.vmem %s32_s20, 128  ;;  %p70_p9 = scmp.lt.s32.totalorder %s32_s20, %s32_s20 }
  0x15   :  { %p66_p8 = scmp.ne.s32.totalorder %s32_s20, %s65_s21  ;;  %p71_p10 = scmp.lt.s32.totalorder %s65_s21, %s65_s21 }
  0x17   :  { %p72_p11 = por %p71_p10, %p70_p9 }
  0x19   :  { %p73_p12 = pnand %p72_p11, %p66_p8 }
  0x85   :  { %v23_v1 = vpop.permute.xlu0 %22 }
  0x86   :  { %24 = vst [vmem:[#allocation5] sm:$0xff] %v23_v1 }
  0x87   :  { %76 = shalt.err (!%p73_p12)
}
  0x88   :  { %s77_s0 = scalar_lea.hbm %s129_s1, 128 }
  0x89   :  { %p78_p13 = scmp.ne.s32.totalorder %s129_s1, %s77_s0  ;;  %p81_p0 = scmp.lt.u32.totalorder %s77_s0, %s129_s1 }
  0x8b   :  { %p83_p1 = pnand %p81_p0, %p78_p13 }
  0x8d   :  { %86 = shalt.err (!%p83_p1)
}
  0x8e   :  { %34 = dma.vmem_to_hbm [thread:$0]  %s32_s20, 128, %s129_s1, [#allocation4]  }
  0x8f   :  { %89 = dma.done.wait [#allocation4], 128  }
  0x90   :  { %90 = vsyncadd [#allocation4], 4294967168 }
  0x91   :  { %38 = vsyncpa [#allocation3], 1 }
  0x92   :  { %39 = vsyncpa [#allocation4], 1 }

</bundles_post_ra>
